<compile_context>
chip_gen: v7x
topology: tpu7x:2x2x1
jax: 0.10.0
libtpu: 0.0.40
codegen_flags: <defaults>
</compile_context>

<pallas_src>
import math

import jax
import jax.numpy as jnp
import numpy as np
from jax.experimental import pallas as pl
from jax.experimental.pallas import tpu as pltpu

_INV_SQRT_2PI = 1.0 / math.sqrt(2.0 * math.pi)
_SQRT_HALF = math.sqrt(0.5)


def _cdiv(a, b):
    return -(-a // b)


def _round_down(v, m):
    return max(m, (v // m) * m)


def _pack(dt):
    # Packed-sublane multiple: 8 rows for 4-byte, 16 for 2-byte, 32 for 1-byte.
    return 8 * max(1, 4 // np.dtype(dt).itemsize)


def _vmem_budget_bytes():
    """Generation-gated double-buffered working-set budget."""
    kind = ""
    try:
        kind = jax.devices()[0].device_kind.lower()
    except Exception:
        pass
    # v2-v5 generations default to 16 MiB scoped VMEM -> stay under ~12 MiB.
    if any(t in kind for t in ("v2", "v3", "v4", "v5")):
        return 12 << 20
    # v6e / v7x: 32 MiB scoped VMEM by default -> ~24 MiB working set.
    return 24 << 20


def _flat_split(n):
    """Factor n into (rows, lanes).  Reshape of a contiguous array is free, so
    aim for a multiple-of-128 lane dim with at least 8 rows."""
    lanes = (32768, 16384, 8192, 4096, 2048, 1024, 512, 256, 128)
    for lane in lanes:
        if n % lane == 0 and n // lane >= 8:
            return n // lane, lane
    for lane in lanes:
        if n % lane == 0:
            return n // lane, lane
    return 1, n


def _pick_tiles(R, L, stream_bpe, col_bpr, row_pack, budget):
    """Choose (tr, tc).  tr is a multiple of row_pack or == R; tc is a multiple
    of 128 or == L.  Double-buffered working set stays under `budget`.  Grids
    may be ragged (cdiv); Pallas masks the edge blocks."""

    def working_set(tr, tc):
        return 2 * (tr * tc * stream_bpe + tr * col_bpr)

    min_tr = R if R < row_pack else row_pack

    # Lane tile first (lane-dense output is the biggest single lever).
    if L <= 128 or working_set(min_tr, L) <= budget:
        tc = L
    else:
        cap = (budget // 2 - min_tr * col_bpr) // (min_tr * stream_bpe)
        tc = _round_down(min(L, max(cap, 128)), 128)

    # Row tile: as tall as the budget allows.
    cap_r = (budget // 2) // (tc * stream_bpe + col_bpr)
    tr = R if R <= cap_r else _round_down(cap_r, row_pack)

    # Guarantee several grid blocks when the problem is big enough (v7x has
    # two TensorCores; the pipeline also needs something to overlap with).
    def nblocks(a, b):
        return _cdiv(R, a) * _cdiv(L, b)

    while nblocks(tr, tc) < 8:
        if tr >= 2 * row_pack:
            tr = _round_down(tr // 2, row_pack)
        elif tc >= 2 * 128:
            tc = _round_down(tc // 2, 128)
        else:
            break
    return tr, tc


def _make_kernel(kinds):
    """kinds: ('full' | 'col' | 'smem') for (x, mu, sigma); trace-time special."""
    x_kind, mu_kind, sigma_kind = kinds

    def _read(ref, kind):
        if kind == "smem":
            return ref[0]                       # f32 scalar from SMEM
        return ref[...].astype(jnp.float32)     # (tr,tc) tile or (tr,1) column

    def kernel(x_ref, mu_ref, sigma_ref, o_ref):
        s = _read(sigma_ref, sigma_kind)
        if sigma_kind == "smem":
            inv = 1.0 / s                       # one scalar divide per step
        else:
            inv = pl.reciprocal(s, approx=False)
        scale = inv * _SQRT_HALF                # folds the -1/2 into 1/sigma
        pref = inv * _INV_SQRT_2PI
        xv = _read(x_ref, x_kind)
        mv = _read(mu_ref, mu_kind)
        z = (mv - xv) * scale
        p = pref * jnp.exp(-(z * z))
        o_ref[...] = jnp.broadcast_to(p, o_ref.shape).astype(o_ref.dtype)

    return kernel


def normal_distribution_forward(x, mu, sigma):
    """Pallas implementation of NormalDistribution.forward(x, mu, sigma)."""
    x, mu, sigma = jnp.asarray(x), jnp.asarray(mu), jnp.asarray(sigma)

    out_shape = jnp.broadcast_shapes(x.shape, mu.shape, sigma.shape)
    dtype = np.dtype(jnp.result_type(x.dtype, mu.dtype, sigma.dtype))
    if (not jnp.issubdtype(dtype, jnp.floating)) or dtype.itemsize > 4:
        dtype = np.dtype(jnp.float32)     # ints promote; f64 (x64 mode) clamps

    n = math.prod(out_shape)
    if n == 0:
        return jnp.zeros(out_shape, dtype)
    nd = len(out_shape)

    ops = [x, mu, sigma]
    aligned = [(1,) * (nd - o.ndim) + tuple(o.shape) for o in ops]
    scalar = [o.size == 1 for o in ops]
    full = [(not scalar[i]) and aligned[i] == tuple(out_shape) for i in range(3)]
    partial = [i for i in range(3) if not scalar[i] and not full[i]]

    # ---- choose the 2-D (R, L) view -----------------------------------------
    k = None
    if partial:
        k_row = max(max(d for d, s in enumerate(aligned[i]) if s != 1) + 1
                    for i in partial)
        if math.prod(out_shape[k_row:]) >= 128:
            k = k_row
    if k is not None:
        R, L = math.prod(out_shape[:k]), math.prod(out_shape[k:])
    else:
        R, L = _flat_split(n)

    # ---- lay out each operand (no full-size HBM broadcasts of params) -------
    prepared = []
    for i, op in enumerate(ops):
        if scalar[i]:
            prepared.append(("smem", op.reshape((1,)).astype(jnp.float32)))
            continue
        if np.dtype(op.dtype).itemsize > 4 or not jnp.issubdtype(op.dtype,
                                                                 jnp.number):
            op = op.astype(jnp.float32)          # 64-bit / bool inputs
        if full[i]:
            prepared.append(("full", op.reshape(R, L)))
        elif k is not None and all(s == 1 for s in aligned[i][k:]):
            col = jnp.broadcast_to(op.reshape(aligned[i][:k]), out_shape[:k])
            prepared.append(("col", col.reshape(R, 1)))
        else:
            # Lane-varying partial operand: has to be materialised (rare).
            big = jnp.broadcast_to(op.reshape(aligned[i]), out_shape)
            prepared.append(("full", big.reshape(R, L)))

    # ---- tile sizing ---------------------------------------------------------
    stream_bpe = dtype.itemsize            # output stream
    col_bpr = 0
    row_pack = _pack(dtype)
    for kind, arr in prepared:
        if kind == "full":
            stream_bpe += np.dtype(arr.dtype).itemsize
            row_pack = max(row_pack, _pack(arr.dtype))
        elif kind == "col":
            col_bpr += 128 * np.dtype(arr.dtype).itemsize   # lane-padded in VMEM
            row_pack = max(row_pack, _pack(arr.dtype))

    tr, tc = _pick_tiles(R, L, stream_bpe, col_bpr, row_pack,
                         _vmem_budget_bytes())
    grid = (_cdiv(R, tr), _cdiv(L, tc))

    tile_spec = pl.BlockSpec((tr, tc), lambda i, j: (i, j))
    col_spec = pl.BlockSpec((tr, 1), lambda i, j: (i, 0))
    smem_spec = pl.BlockSpec(memory_space=pltpu.MemorySpace.SMEM)
    spec_of = {"full": tile_spec, "col": col_spec, "smem": smem_spec}

    bytes_accessed = n * dtype.itemsize + sum(
        int(arr.size) * np.dtype(arr.dtype).itemsize for _, arr in prepared)

    out2d = pl.pallas_call(
        _make_kernel(tuple(kind for kind, _ in prepared)),
        out_shape=jax.ShapeDtypeStruct((R, L), dtype),
        grid=grid,
        in_specs=[spec_of[kind] for kind, _ in prepared],
        out_specs=tile_spec,
        compiler_params=pltpu.CompilerParams(
            dimension_semantics=("parallel", "parallel")),
        cost_estimate=pl.CostEstimate(
            flops=6 * n, transcendentals=n, bytes_accessed=int(bytes_accessed)),
    )(*(arr for _, arr in prepared))
    return out2d.reshape(out_shape)


def _reference(x, mu, sigma):
    return (1.0 / (sigma * jnp.sqrt(2.0 * jnp.pi))) * jnp.exp(
        -0.5 * ((mu - x) / sigma) ** 2)


if __name__ == "__main__":
    # NormalDistribution has no learned parameters (reset_parameters only sets
    # scalar defaults _mu=0, _sigma=1); all forward inputs are runtime tensors.
    # TODO(synk): sample()/mean()/mode()/variance() are stateful helpers with
    # no forward-pass compute; only forward() is implemented as a kernel.
    key = jax.random.PRNGKey(0)
    kx, kmu, ksig = jax.random.split(key, 3)

    B, C, H, W = 2, 4, 16, 16
    x = jax.random.normal(kx, (B, C, H, W), dtype=jnp.float32)
    mu = jax.random.normal(kmu, (1, C, 1, 1), dtype=jnp.float32)
    sigma = jax.nn.softplus(
        jax.random.normal(ksig, (1, C, 1, 1), dtype=jnp.float32)) + 0.1

    # Row-broadcast path: per-channel mu/sigma as (R,1) VMEM columns.
    p = jax.block_until_ready(normal_distribution_forward(x, mu, sigma))
    ref = _reference(x, mu, sigma)
    assert p.shape == ref.shape and p.dtype == ref.dtype, (p.shape, p.dtype)
    assert jnp.allclose(p, ref, atol=1e-5, rtol=1e-5), float(
        jnp.max(jnp.abs(p - ref)))

    # Flat path: full-shape mu streamed, scalar sigma through SMEM.
    mu_full = jax.random.normal(kmu, (B, C, H, W), dtype=jnp.float32)
    sigma_s = jnp.float32(0.7)
    p2 = jax.block_until_ready(normal_distribution_forward(x, mu_full, sigma_s))
    ref2 = _reference(x, mu_full, sigma_s)
    assert p2.shape == ref2.shape, (p2.shape, ref2.shape)
    assert jnp.allclose(p2, ref2, atol=1e-5, rtol=1e-5), float(
        jnp.max(jnp.abs(p2 - ref2)))

    # Ragged path: spatial size not a multiple of 128 exercises cdiv grids
    # with masked edge blocks (no padding copies).
    x3 = jax.random.normal(kx, (2, 4, 16, 20), dtype=jnp.float32)
    mu3 = jax.random.normal(kmu, (1, 4, 1, 1), dtype=jnp.float32)
    sig3 = jax.nn.softplus(
        jax.random.normal(ksig, (1, 4, 1, 1), dtype=jnp.float32)) + 0.1
    p3 = jax.block_until_ready(normal_distribution_forward(x3, mu3, sig3))
    ref3 = _reference(x3, mu3, sig3)
    assert p3.shape == ref3.shape, (p3.shape, ref3.shape)
    assert jnp.allclose(p3, ref3, atol=1e-5, rtol=1e-5), float(
        jnp.max(jnp.abs(p3 - ref3)))

    print("KERNEL_OK")
</pallas_src>

<mosaic_0001>
module attributes {stable_mosaic.version = 11 : i64} {
  func.func @kernel(%arg0: i32, %arg1: i32, %arg2: memref<8x128xf32, #tpu.memory_space<vmem>>, %arg3: memref<8x1xf32, #tpu.memory_space<vmem>>, %arg4: memref<8x1xf32, #tpu.memory_space<vmem>>, %arg5: memref<8x128xf32, #tpu.memory_space<vmem>>) attributes {dimension_semantics = [#tpu.dimension_semantics<parallel>, #tpu.dimension_semantics<parallel>], iteration_bounds = array<i64: 1, 2>, scalar_prefetch = 0 : i64, scratch_operands = 0 : i64, tpu.core_type = #tpu.core_type<tc>, window_params = [{transform_indices = @transform_0, window_bounds = array<i64: 8, 128>}, {transform_indices = @transform_1, window_bounds = array<i64: 8, 1>}, {transform_indices = @transform_2, window_bounds = array<i64: 8, 1>}, {transform_indices = @transform_3, window_bounds = array<i64: 8, 128>}]} {
    %c0 = arith.constant 0 : index
    %c0_0 = arith.constant 0 : index
    %0 = vector.load %arg4[%c0, %c0_0] : memref<8x1xf32, #tpu.memory_space<vmem>>, vector<8x1xf32>
    %1 = tpu.reciprocal %0 : vector<8x1xf32> -> vector<8x1xf32>
    %cst = arith.constant 0.707106769 : f32
    %2 = vector.broadcast %cst : f32 to vector<8x1xf32>
    %3 = arith.mulf %1, %2 : vector<8x1xf32>
    %cst_1 = arith.constant 0.398942292 : f32
    %4 = vector.broadcast %cst_1 : f32 to vector<8x1xf32>
    %5 = arith.mulf %1, %4 : vector<8x1xf32>
    %c0_2 = arith.constant 0 : index
    %c0_3 = arith.constant 0 : index
    %6 = vector.load %arg2[%c0_2, %c0_3] : memref<8x128xf32, #tpu.memory_space<vmem>>, vector<8x128xf32>
    %c0_4 = arith.constant 0 : index
    %c0_5 = arith.constant 0 : index
    %7 = vector.load %arg3[%c0_4, %c0_5] : memref<8x1xf32, #tpu.memory_space<vmem>>, vector<8x1xf32>
    %8 = vector.broadcast %7 : vector<8x1xf32> to vector<8x128xf32>
    %9 = arith.subf %8, %6 : vector<8x128xf32>
    %10 = vector.broadcast %3 : vector<8x1xf32> to vector<8x128xf32>
    %11 = arith.mulf %9, %10 : vector<8x128xf32>
    %12 = arith.mulf %11, %11 : vector<8x128xf32>
    %cst_6 = arith.constant 0.000000e+00 : f32
    %13 = vector.broadcast %cst_6 : f32 to vector<8x128xf32>
    %14 = arith.subf %13, %12 : vector<8x128xf32>
    %15 = math.exp %14 : vector<8x128xf32>
    %16 = vector.broadcast %5 : vector<8x1xf32> to vector<8x128xf32>
    %17 = arith.mulf %16, %15 : vector<8x128xf32>
    %c0_7 = arith.constant 0 : index
    %c0_8 = arith.constant 0 : index
    %18 = vector.load %arg5[%c0_7, %c0_8] : memref<8x128xf32, #tpu.memory_space<vmem>>, vector<8x128xf32>
    tpu.vector_store %arg5[%c0_7, %c0_8], %17 {strides = array<i32>} : memref<8x128xf32, #tpu.memory_space<vmem>>, vector<8x128xf32>,
    return
  }
  func.func @transform_0(%arg0: i32, %arg1: i32) -> (i32, i32) {
    %c0_i32 = arith.constant 0 : i32
    return %arg0, %arg1 : i32, i32
  }
  func.func @transform_1(%arg0: i32, %arg1: i32) -> (i32, i32) {
    %c0_i32 = arith.constant 0 : i32
    %c0_i32_0 = arith.constant 0 : i32
    return %arg0, %c0_i32 : i32, i32
  }
  func.func @transform_2(%arg0: i32, %arg1: i32) -> (i32, i32) {
    %c0_i32 = arith.constant 0 : i32
    %c0_i32_0 = arith.constant 0 : i32
    return %arg0, %c0_i32 : i32, i32
  }
  func.func @transform_3(%arg0: i32, %arg1: i32) -> (i32, i32) {
    %c0_i32 = arith.constant 0 : i32
    return %arg0, %arg1 : i32, i32
  }
}

</mosaic_0001>

<bundles_post_ra>
// kernel: tpu_custom_call.1
= control target key start
LH: loop header
LB: loop body
LE: loop exit
PB: predicated region body
PF: predicated region fallthrough
CT: control target
= control target key end

     0   :  { %8 = vsyncpa [#allocation3], 0  ;;  %s673_s0 = inlined_call_operand.vmem [shape: f32[8,256], index: 0, kind: input, shape index: {}]   ;;  %s674_s1 = inlined_call_operand.vmem [shape: f32[8,1], index: 1, kind: input, shape index: {}]   ;;  %s675_s2 = inlined_call_operand.vmem [shape: f32[8,1], index: 2, kind: input, shape index: {}]   ;;  %s676_s3 = inlined_call_operand.hbm [shape: f32[8,256], index: 3, kind: output, shape index: {}]  }
   0x1   :  { %10 = vsyncpa [#allocation3 + $0x1], 0  ;;  %s555_s12 = smov 0   ;;  %s557_s13 = smov 0  }
   0x2   :  { %s559_s14 = smov 0   ;;  %s561_s15 = smov 0  }
   0x3   :  { %s563_s16 = smov 0   ;;  %s565_s17 = smov 0  }
   0x4 LB: > { %s378_s18 = sadd.s32 4294967295, %s531_s17   ;;  %s379_s19 = sadd.s32 4294967294, %s531_s17   ;;  %s531_s17 = sphi %s565_s17, %s16_s17   ;;  %s527_s16 = sphi %s563_s16, %s683_s16   ;;  %s523_s15 = sphi %s561_s15, %s682_s15   ;;  %s519_s14 = sphi %s559_s14, %s681_s14   ;;  %s515_s13 = sphi %s557_s13, %s680_s13   ;;  %s511_s12 = sphi %s555_s12, %s679_s12  }
   0x5   : > { %s25_s20 = sadd.s32 1, %s527_s16  ;;  %s117_s21 = sadd.s32 1, %s519_s14 }
   0x6   : > { %p26_p0 = scmp.ge.s32.totalorder %s25_s20, 2  ;;  %p127_p1 = scmp.ne.s32.totalorder %s519_s14, %s515_s13 }
   0x7   : > { %p128_p2 = scmp.eq.s32.totalorder %s378_s18, 1  ;;  %p133_p3 = scmp.ne.s32.totalorder %s515_s13, %s511_s12 }
   0x8   : > { %s685_s20 = smov (%p26_p0, %s25_s20), 0  ;;  %p134_p5 = scmp.eq.s32.totalorder %s379_s19, 1 }
   0x9   : > { %p595_p4 = por %p128_p2, %p127_p1  ;;  %s113_s23 = ssub.s32 %s527_s16, %s685_s20 }
   0xa   : > { %p384_p6 = scmp.ge.s32.totalorder %s531_s17, 1  ;;  %p115_p7 = scmp.eq.s32.totalorder %s113_s23, 0 }
   0xb   : > { %p602_p8 = por %p134_p5, %p133_p3  ;;  %p177_p9 = scmp.lt.s32.totalorder %s531_s17, 3 }
   0xc   : > { %s608_s25 = scalar_select %p115_p7, %s519_s14, %s117_s21  }
   0xd   : > { %p178_p10 = pnand %p384_p6, %p177_p9 }
   0xe   : > { %v233_v0 = vld [vmem:[%s674_s1] sm:$0xff] (!%p178_p10)  ;;  %v533_v2 = vmov (!%p178_p10), 0   ;;  %p214_p11 = scmp.lt.s32.totalorder (!%p178_p10), %s523_s15, 1  ;;  %s209_s8 = sand.u32 (!%p178_p10), 1, %s515_s13  }
   0xf   : > { %181 = sbr.rel (%p178_p10) target bundleno = 192 (0xc0), region = 32  ;;  %v228_v1 = vld [vmem:[%s675_s2] sm:$0xff] (!%p178_p10)  ;;  %447 = vset.pattern.permute.xlu0 (!%p178_p10), %v533_v2  ;;  %448 = vset.pattern.permute.xlu1 (!%p178_p10), %v533_v2  ;;  %s385_s9 = sshll.u32 (!%p178_p10), %s209_s8, 3 }
  0x10   : > { %449 = vrcp.f32 (!%p178_p10), %v228_v1  ;;  %236 = vperm.xlu0 (!%p178_p10), %447, %v233_v0   ;;  %s388_s10 = sshll.u32 (!%p178_p10), %s523_s15, 7  ;;  %s211_s11 = scalar_lea.vmem (!%p178_p10), [#allocation2], %s385_s9 }
  0x11   : > { %s273_s18 = sshll.u32 (!%p178_p10), %s211_s11, 4  ;;  %s626_s23 = scalar_lea.hbm (!%p178_p10), %s676_s3, %s388_s10  ;;  %s628_s18 = int_to_ptr.vmem [resolvable:$true] %s273_s18 }
  0x12   : > { %s258_s26 = scalar_lea.sflag (!%p178_p10), [#allocation3], %s209_s8  ;;  %s453_s27 = scalar_lea.vmem (!%p178_p10), %s628_s18, 128 }
  0x13   : > { %p454_p12 = scmp.ne.s32.totalorder (!%p178_p10), %s628_s18, %s453_s27 }
  0x15   : > { %p455_p13 = pnand (!%p178_p10), %p454_p12, %p595_p4 }
  0x16   : > { %s215_s30 = scalar_select %p214_p11, %s523_s15, 1 }
  0x17   : > { %p456_p0 = pneg %p455_p13  ;;  %s534_s15 = smov [#allocation2]  }
  0x18   : > { %s386_s4 = sshll.u32 %s215_s30, 3  ;;  %s457_s28 = sshll.u32 %s534_s15, 4  ;;  %s458_s28 = int_to_ptr.vmem [resolvable:$false] %s457_s28 }
  0x19   : > { %s219_s7 = scalar_lea.vmem %s673_s0, %s386_s4  ;;  %s459_s29 = scalar_lea.vmem %s458_s28, 256 }
  0x1a   : > { %v450_v3 = vpop.eup %449  ;;  %v232_v7 = vld [vmem:[%s219_s7] sm:$0xff]  ;;  %p460_p1 = scmp.lt.s32.totalorder %s628_s18, %s458_s28  ;;  %p461_p2 = scmp.lt.s32.totalorder %s459_s29, %s453_s27 }
  0x1b   : > { %v230_v4 = vmul.f32 0.70710677, %v450_v3  ;;  %v231_v5 = vmul.f32 0.3989423, %v450_v3 }
  0x1c   : > { %p462_p3 = por %p461_p2, %p460_p1 }
  0x1d   : > { %242 = vperm.xlu0 %447, %v230_v4   ;;  %252 = vperm.xlu1 %448, %v231_v5  }
  0x1e   : > { %p463_p5 = pnand %p462_p3, %p456_p0 }
  0x8f   : > { %v237_v6 = vpop.permute.xlu0 %236 }
  0x90   : > { %v239_v8 = vsub.f32 %v237_v6, %v232_v7 }
  0x9c   : > { %v243_v9 = vpop.permute.xlu0 %242  ;;  %v253_v14 = vpop.permute.xlu1 %252 }
  0x9d   : > { %v245_v10 = vmul.f32 %v243_v9, %v239_v8 }
  0x9f   : > { %v246_v11 = vmul.f32 %v245_v10, %v245_v10 }
  0xa1   : > { %v247_v12 = vsub.f32 0.0, %v246_v11 }
  0xa3   : > { %v248_v13 = vmul.f32 1.442695, %v247_v12 }
  0xa5   : > { %451 = vpow2.f32 %v248_v13 }
  0xaf   : > { %v452_v15 = vpop.eup %451 }
  0xb0   : > { %v255_v16 = vmul.f32 %v452_v15, %v253_v14 }
  0xb2   : > { %256 = vst [vmem:[%s211_s11] sm:$0xff] %v255_v16 }
  0xb3   : > { %466 = shalt.err (!%p463_p5)
}
  0xb4   : > { %s467_s30 = scalar_lea.hbm %s626_s23, 128  ;;  %s471_s6 = scalar_lea.hbm %s676_s3, 256 }
  0xb5   : > { %p468_p6 = scmp.ne.s32.totalorder %s626_s23, %s467_s30  ;;  %p472_p10 = scmp.lt.u32.totalorder %s626_s23, %s676_s3 }
  0xb6   : > { %p473_p11 = scmp.lt.u32.totalorder %s471_s6, %s467_s30  ;;  %p475_p13 = scmp.lt.u32.totalorder %s467_s30, %s626_s23 }
  0xb7   : > { %p469_p7 = pnand %p468_p6, %p595_p4 }
  0xb8   : > { %p474_p12 = por %p473_p11, %p472_p10 }
  0xb9   : > { %p470_p9 = pneg %p469_p7 }
  0xba   : > { %p476_p0 = por %p475_p13, %p474_p12 }
  0xbc   : > { %p477_p1 = pnand %p476_p0, %p470_p9 }
  0xbe   : > { %480 = shalt.err (!%p477_p1)
}
  0xbf   : > { %391 = dma.vmem_to_hbm [thread:$0]  (%p595_p4), %s628_s18, 128, %s626_s23, %s258_s26  }
  0xc0 PF: > { %p397_p2 = scmp.ge.s32.totalorder %s531_s17, 2  ;;  %s285_s9 = sand.u32 1, %s511_s12  }
  0xc1   : > { %s286_s10 = scalar_lea.sflag [#allocation3], %s285_s9 }
  0xc2   : > { %p394_p3 = pnand %p397_p2, %p602_p8 }
  0xc4   : > { %506 = dma.done.wait (!%p394_p3), %s286_s10, 128  }
  0xc5   : > { %508 = vsyncadd (!%p394_p3), %s286_s10, 4294967168  ;;  %s16_s17 = sadd.s32 1, %s531_s17   ;;  %s679_s12 = smov %s515_s13 }
  0xc6   : > { %p13_p5 = scmp.ge.s32.totalorder %s16_s17, 4   ;;  %s680_s13 = smov %s519_s14 }
  0xc7   : > { %s681_s14 = smov %s608_s25  ;;  %s682_s15 = smov %s527_s16 }
  0xc8   : > { %s683_s16 = smov %s685_s20  ;;  %15 = sbr.rel (!%p13_p5) target bundleno = 4 (0x4), region = 73 }
  0xcf   :  { %291 = vsyncpa [#allocation3], 1 }
  0xd0   :  { %293 = vsyncpa [#allocation3 + $0x1], 1 }

</bundles_post_ra>
